<compile_context>
chip_gen: v5e
topology: v5e:2x2
jax: 0.10.0
libtpu: 0.0.40
codegen_flags: <defaults>
</compile_context>

<pallas_src>
import functools

import jax
import jax.numpy as jnp
from jax.experimental import pallas as pl
from jax.experimental.pallas import tpu as pltpu


def _round_up(x, m):
    return ((x + m - 1) // m) * m


def _make_fused_fc_kernel(num_layers):
    """Kernel computing `num_layers` fused (Linear -> ReLU) blocks on one batch
    tile; intermediates live in registers/VMEM and never touch HBM."""

    def kernel(*refs):
        # refs = (x_ref, w1_ref, b1_ref, ..., wL_ref, bL_ref, o_ref)
        x_ref = refs[0]
        o_ref = refs[-1]
        h = x_ref[...]                                        # bf16 activations
        for layer in range(num_layers):
            w_ref = refs[1 + 2 * layer]
            b_ref = refs[2 + 2 * layer]
            # bf16 x bf16 matmul with f32 accumulation on the MXU.
            y = jnp.dot(h, w_ref[...], preferred_element_type=jnp.float32)
            y = jnp.maximum(y + b_ref[...], 0.0)              # bias + ReLU in f32
            # Feed the next matmul in bf16; keep the final layer's result in f32.
            h = y.astype(jnp.bfloat16) if layer + 1 < num_layers else y
        o_ref[...] = h.astype(o_ref.dtype)

    return kernel


def _pick_batch_tile(batch):
    """Rows per grid step.  Multiples of 128 keep the MXU full; requiring at
    least two grid steps lets v7x shard the 'parallel' axis across both
    TensorCores.  Capped at 256 so the f32 intermediates plus the resident
    weight stack stay comfortably inside v7x's 64 MiB VMEM."""
    for tm in (256, 128):
        if batch >= 2 * tm:
            return tm
    if batch > 128:
        return 128
    # Tiny batches: a single small tile, rounded up to a sublane multiple of 8.
    return _round_up(max(batch, 1), 8)


def _resident_spec(shape, single_buffer):
    """Full-block spec with a constant index_map: operand stays VMEM-resident
    across the whole grid.  Single-buffering avoids the default double-buffer's
    2x VMEM cost for these constant operands."""
    if single_buffer:
        return pl.BlockSpec(shape, lambda i: (0, 0),
                            pipeline_mode=pl.Buffered(buffer_count=1))
    return pl.BlockSpec(shape, lambda i: (0, 0))


@functools.partial(jax.jit,
                   static_argnames=("out_features", "single_buffer_weights"))
def _fc_forward_impl(x, layer_params, *, out_features, single_buffer_weights):
    B, in0 = x.shape
    num_layers = len(layer_params)
    in0_pad = layer_params[0][0].shape[0]
    out_pad = layer_params[-1][0].shape[1]

    tm = _pick_batch_tile(B)
    b_pad = _round_up(B, tm)
    grid = (b_pad // tm,)

    # Zero-pad batch/features and cast activations to bf16 for the MXU.
    x_pad = jnp.zeros((b_pad, in0_pad), jnp.bfloat16)
    x_pad = x_pad.at[:B, :in0].set(x.astype(jnp.bfloat16))

    in_specs = [pl.BlockSpec((tm, in0_pad), lambda i: (i, 0))]
    flat_params = []
    flops = 0
    param_bytes = 0
    widest = in0_pad
    for w, b in layer_params:
        in_specs.append(_resident_spec(w.shape, single_buffer_weights))
        in_specs.append(_resident_spec(b.shape, single_buffer_weights))
        flat_params.extend([w, b])
        flops += 2 * b_pad * w.shape[0] * w.shape[1]
        param_bytes += (w.size * w.dtype.itemsize + b.size * b.dtype.itemsize)
        widest = max(widest, w.shape[1])

    in_bytes = b_pad * in0_pad * 2          # bf16 input
    out_bytes = b_pad * out_pad * 4         # f32 output

    # VMEM budget: single-buffered weight stack + double-buffered x/out tiles
    # + live f32 intermediates, 2x headroom, clamped to v7x's 64 MiB per TC.
    vmem_bytes = (param_bytes
                  + 2 * tm * in0_pad * 2
                  + 2 * tm * out_pad * 4
                  + 2 * tm * widest * 4)
    vmem_limit = int(min(max(2 * vmem_bytes, 16 << 20), 64 << 20))

    out = pl.pallas_call(
        _make_fused_fc_kernel(num_layers),
        out_shape=jax.ShapeDtypeStruct((b_pad, out_pad), jnp.float32),
        grid=grid,
        in_specs=in_specs,
        out_specs=pl.BlockSpec((tm, out_pad), lambda i: (i, 0)),
        compiler_params=pltpu.CompilerParams(
            dimension_semantics=("parallel",),
            vmem_limit_bytes=vmem_limit,
        ),
        cost_estimate=pl.CostEstimate(
            flops=flops,
            transcendentals=0,
            bytes_accessed=in_bytes + param_bytes + out_bytes,
        ),
    )(x_pad, *flat_params)

    # Strip batch/feature padding; output stays f32 (module semantics).
    return out[:B, :out_features]


def fc_forward(x, layer_params, out_features):
    """Fused FC forward: all (Linear -> ReLU) layers in one pallas_call.

    Tries single-buffered resident weights first; falls back to default
    buffering if this Pallas version rejects Buffered(1)."""
    try:
        return _fc_forward_impl(x, layer_params, out_features=out_features,
                                single_buffer_weights=True)
    except Exception:  # pragma: no cover - compat fallback, never hides results
        return _fc_forward_impl(x, layer_params, out_features=out_features,
                                single_buffer_weights=False)


def init_fc_params(params, key, dtype=jnp.bfloat16):
    """nn.Linear-style init (uniform +-1/sqrt(fan_in)) with all layout work
    hoisted out of the forward path:
      * weights pre-transposed to (in, out), zero-padded to multiples of 128 on
        both axes, and cast to bf16 for the MXU,
      * biases stored as f32 (1, out_pad) rows (bias-add happens in f32).
    Returns a list of (w_t, bias) per layer."""
    layers = []
    for (in_f, out_f) in params:
        key, kw, kb = jax.random.split(key, 3)
        bound = 1.0 / float(in_f) ** 0.5
        w = jax.random.uniform(kw, (out_f, in_f), dtype=jnp.float32,
                               minval=-bound, maxval=bound)
        b = jax.random.uniform(kb, (out_f,), dtype=jnp.float32,
                               minval=-bound, maxval=bound)
        in_pad, out_pad = _round_up(in_f, 128), _round_up(out_f, 128)
        w_t = jnp.zeros((in_pad, out_pad), jnp.float32).at[:in_f, :out_f].set(w.T)
        b2 = jnp.zeros((1, out_pad), jnp.float32).at[:, :out_f].set(b)
        layers.append((w_t.astype(dtype), b2))
    return layers


def fc_reference(x, layer_params, out_features):
    """Plain-JAX reference mirroring the kernel's numerics (bf16 operands,
    f32 accumulation, f32 bias + ReLU)."""
    in0 = x.shape[1]
    in_pad = layer_params[0][0].shape[0]
    h = jnp.zeros((x.shape[0], in_pad), jnp.bfloat16)
    h = h.at[:, :in0].set(x.astype(jnp.bfloat16))
    num_layers = len(layer_params)
    for i, (w_t, b2) in enumerate(layer_params):
        y = jnp.dot(h, w_t, preferred_element_type=jnp.float32) + b2
        y = jnp.maximum(y, 0.0)
        h = y.astype(jnp.bfloat16) if i + 1 < num_layers else y
    return h[:, :out_features]


if __name__ == "__main__":
    key = jax.random.PRNGKey(0)

    # FC(params=[(32, 64), (64, 64), (64, 16)]) with batch=2.
    fc_layer_shapes = [(32, 64), (64, 64), (64, 16)]
    batch = 2
    out_features = fc_layer_shapes[-1][1]

    key, kx, kp = jax.random.split(key, 3)
    x = jax.random.normal(kx, (batch, fc_layer_shapes[0][0]), dtype=jnp.float32)
    layer_params = init_fc_params(fc_layer_shapes, kp)

    out = fc_forward(x, layer_params, out_features)
    out = jax.block_until_ready(out)

    ref = fc_reference(x, layer_params, out_features)
    assert out.shape == (batch, out_features)
    assert out.dtype == jnp.float32
    # bf16 operands / f32 accumulation -> tolerance loosened vs pure-f32.
    assert jnp.allclose(out, ref, atol=2e-2, rtol=2e-2), "mismatch vs reference"

    print("KERNEL_OK")
</pallas_src>

<mosaic_0001>
module attributes {stable_mosaic.version = 11 : i64} {
  func.func @kernel(%arg0: i32, %arg1: memref<8x128xbf16, #tpu.memory_space<vmem>>, %arg2: memref<128x128xbf16, #tpu.memory_space<vmem>>, %arg3: memref<1x128xf32, #tpu.memory_space<vmem>>, %arg4: memref<128x128xbf16, #tpu.memory_space<vmem>>, %arg5: memref<1x128xf32, #tpu.memory_space<vmem>>, %arg6: memref<128x128xbf16, #tpu.memory_space<vmem>>, %arg7: memref<1x128xf32, #tpu.memory_space<vmem>>, %arg8: memref<8x128xf32, #tpu.memory_space<vmem>>) attributes {dimension_semantics = [#tpu.dimension_semantics<parallel>], iteration_bounds = array<i64: 1>, scalar_prefetch = 0 : i64, scratch_operands = 0 : i64, tpu.core_type = #tpu.core_type<tc>, window_params = [{transform_indices = @transform_0, window_bounds = array<i64: 8, 128>}, {pipeline_mode = #tpu.pipeline_mode<synchronous>, transform_indices = @transform_1, window_bounds = array<i64: 128, 128>}, {pipeline_mode = #tpu.pipeline_mode<synchronous>, transform_indices = @transform_2, window_bounds = array<i64: 1, 128>}, {pipeline_mode = #tpu.pipeline_mode<synchronous>, transform_indices = @transform_3, window_bounds = array<i64: 128, 128>}, {pipeline_mode = #tpu.pipeline_mode<synchronous>, transform_indices = @transform_4, window_bounds = array<i64: 1, 128>}, {pipeline_mode = #tpu.pipeline_mode<synchronous>, transform_indices = @transform_5, window_bounds = array<i64: 128, 128>}, {pipeline_mode = #tpu.pipeline_mode<synchronous>, transform_indices = @transform_6, window_bounds = array<i64: 1, 128>}, {transform_indices = @transform_7, window_bounds = array<i64: 8, 128>}]} {
    %c0 = arith.constant 0 : index
    %c0_0 = arith.constant 0 : index
    %0 = vector.load %arg1[%c0, %c0_0] : memref<8x128xbf16, #tpu.memory_space<vmem>>, vector<8x128xbf16>
    %c0_1 = arith.constant 0 : index
    %c0_2 = arith.constant 0 : index
    %1 = vector.load %arg2[%c0_1, %c0_2] : memref<128x128xbf16, #tpu.memory_space<vmem>>, vector<128x128xbf16>
    %cst = arith.constant dense<0.000000e+00> : vector<8x128xf32>
    %2 = tpu.matmul %0, %1, %cst {dimension_numbers = #tpu.dot_dimension_numbers<[1], [0], [0], [1], [0, 0, 1, 1], [], []>} : vector<8x128xbf16>, vector<128x128xbf16>, vector<8x128xf32> -> vector<8x128xf32>
    %c0_3 = arith.constant 0 : index
    %c0_4 = arith.constant 0 : index
    %3 = vector.load %arg3[%c0_3, %c0_4] : memref<1x128xf32, #tpu.memory_space<vmem>>, vector<1x128xf32>
    %4 = vector.broadcast %3 : vector<1x128xf32> to vector<8x128xf32>
    %5 = arith.addf %2, %4 : vector<8x128xf32>
    %cst_5 = arith.constant 0.000000e+00 : f32
    %6 = vector.broadcast %cst_5 : f32 to vector<8x128xf32>
    %7 = arith.maximumf %5, %6 : vector<8x128xf32>
    %8 = arith.truncf %7 : vector<8x128xf32> to vector<8x128xbf16>
    %c0_6 = arith.constant 0 : index
    %c0_7 = arith.constant 0 : index
    %9 = vector.load %arg4[%c0_6, %c0_7] : memref<128x128xbf16, #tpu.memory_space<vmem>>, vector<128x128xbf16>
    %cst_8 = arith.constant dense<0.000000e+00> : vector<8x128xf32>
    %10 = tpu.matmul %8, %9, %cst_8 {dimension_numbers = #tpu.dot_dimension_numbers<[1], [0], [0], [1], [0, 0, 1, 1], [], []>} : vector<8x128xbf16>, vector<128x128xbf16>, vector<8x128xf32> -> vector<8x128xf32>
    %c0_9 = arith.constant 0 : index
    %c0_10 = arith.constant 0 : index
    %11 = vector.load %arg5[%c0_9, %c0_10] : memref<1x128xf32, #tpu.memory_space<vmem>>, vector<1x128xf32>
    %12 = vector.broadcast %11 : vector<1x128xf32> to vector<8x128xf32>
    %13 = arith.addf %10, %12 : vector<8x128xf32>
    %cst_11 = arith.constant 0.000000e+00 : f32
    %14 = vector.broadcast %cst_11 : f32 to vector<8x128xf32>
    %15 = arith.maximumf %13, %14 : vector<8x128xf32>
    %16 = arith.truncf %15 : vector<8x128xf32> to vector<8x128xbf16>
    %c0_12 = arith.constant 0 : index
    %c0_13 = arith.constant 0 : index
    %17 = vector.load %arg6[%c0_12, %c0_13] : memref<128x128xbf16, #tpu.memory_space<vmem>>, vector<128x128xbf16>
    %cst_14 = arith.constant dense<0.000000e+00> : vector<8x128xf32>
    %18 = tpu.matmul %16, %17, %cst_14 {dimension_numbers = #tpu.dot_dimension_numbers<[1], [0], [0], [1], [0, 0, 1, 1], [], []>} : vector<8x128xbf16>, vector<128x128xbf16>, vector<8x128xf32> -> vector<8x128xf32>
    %c0_15 = arith.constant 0 : index
    %c0_16 = arith.constant 0 : index
    %19 = vector.load %arg7[%c0_15, %c0_16] : memref<1x128xf32, #tpu.memory_space<vmem>>, vector<1x128xf32>
    %20 = vector.broadcast %19 : vector<1x128xf32> to vector<8x128xf32>
    %21 = arith.addf %18, %20 : vector<8x128xf32>
    %cst_17 = arith.constant 0.000000e+00 : f32
    %22 = vector.broadcast %cst_17 : f32 to vector<8x128xf32>
    %23 = arith.maximumf %21, %22 : vector<8x128xf32>
    %c0_18 = arith.constant 0 : index
    %c0_19 = arith.constant 0 : index
    %24 = vector.load %arg8[%c0_18, %c0_19] : memref<8x128xf32, #tpu.memory_space<vmem>>, vector<8x128xf32>
    tpu.vector_store %arg8[%c0_18, %c0_19], %23 {strides = array<i32>} : memref<8x128xf32, #tpu.memory_space<vmem>>, vector<8x128xf32>,
    return
  }
  func.func @transform_0(%arg0: i32) -> (i32, i32) {
    %c0_i32 = arith.constant 0 : i32
    %c0_i32_0 = arith.constant 0 : i32
    return %arg0, %c0_i32 : i32, i32
  }
  func.func @transform_1(%arg0: i32) -> (i32, i32) {
    %c0_i32 = arith.constant 0 : i32
    %c0_i32_0 = arith.constant 0 : i32
    %c0_i32_1 = arith.constant 0 : i32
    return %c0_i32, %c0_i32_0 : i32, i32
  }
  func.func @transform_2(%arg0: i32) -> (i32, i32) {
    %c0_i32 = arith.constant 0 : i32
    %c0_i32_0 = arith.constant 0 : i32
    %c0_i32_1 = arith.constant 0 : i32
    return %c0_i32, %c0_i32_0 : i32, i32
  }
  func.func @transform_3(%arg0: i32) -> (i32, i32) {
    %c0_i32 = arith.constant 0 : i32
    %c0_i32_0 = arith.constant 0 : i32
    %c0_i32_1 = arith.constant 0 : i32
    return %c0_i32, %c0_i32_0 : i32, i32
  }
  func.func @transform_4(%arg0: i32) -> (i32, i32) {
    %c0_i32 = arith.constant 0 : i32
    %c0_i32_0 = arith.constant 0 : i32
    %c0_i32_1 = arith.constant 0 : i32
    return %c0_i32, %c0_i32_0 : i32, i32
  }
  func.func @transform_5(%arg0: i32) -> (i32, i32) {
    %c0_i32 = arith.constant 0 : i32
    %c0_i32_0 = arith.constant 0 : i32
    %c0_i32_1 = arith.constant 0 : i32
    return %c0_i32, %c0_i32_0 : i32, i32
  }
  func.func @transform_6(%arg0: i32) -> (i32, i32) {
    %c0_i32 = arith.constant 0 : i32
    %c0_i32_0 = arith.constant 0 : i32
    %c0_i32_1 = arith.constant 0 : i32
    return %c0_i32, %c0_i32_0 : i32, i32
  }
  func.func @transform_7(%arg0: i32) -> (i32, i32) {
    %c0_i32 = arith.constant 0 : i32
    %c0_i32_0 = arith.constant 0 : i32
    return %arg0, %c0_i32 : i32, i32
  }
}

module attributes {stable_mosaic.version = 11 : i64} {
  func.func @kernel(%arg0: i32, %arg1: memref<8x128xbf16, #tpu.memory_space<vmem>>, %arg2: memref<128x128xbf16, #tpu.memory_space<vmem>>, %arg3: memref<1x128xf32, #tpu.memory_space<vmem>>, %arg4: memref<128x128xbf16, #tpu.memory_space<vmem>>, %arg5: memref<1x128xf32, #tpu.memory_space<vmem>>, %arg6: memref<128x128xbf16, #tpu.memory_space<vmem>>, %arg7: memref<1x128xf32, #tpu.memory_space<vmem>>, %arg8: memref<8x128xf32, #tpu.memory_space<vmem>>) attributes {dimension_semantics = [#tpu.dimension_semantics<parallel>], iteration_bounds = array<i64: 1>, scalar_prefetch = 0 : i64, scratch_operands = 0 : i64, tpu.core_type = #tpu.core_type<tc>, window_params = [{transform_indices = @transform_0, window_bounds = array<i64: 8, 128>}, {pipeline_mode = #tpu.pipeline_mode<synchronous>, transform_indices = @transform_1, window_bounds = array<i64: 128, 128>}, {pipeline_mode = #tpu.pipeline_mode<synchronous>, transform_indices = @transform_2, window_bounds = array<i64: 1, 128>}, {pipeline_mode = #tpu.pipeline_mode<synchronous>, transform_indices = @transform_3, window_bounds = array<i64: 128, 128>}, {pipeline_mode = #tpu.pipeline_mode<synchronous>, transform_indices = @transform_4, window_bounds = array<i64: 1, 128>}, {pipeline_mode = #tpu.pipeline_mode<synchronous>, transform_indices = @transform_5, window_bounds = array<i64: 128, 128>}, {pipeline_mode = #tpu.pipeline_mode<synchronous>, transform_indices = @transform_6, window_bounds = array<i64: 1, 128>}, {transform_indices = @transform_7, window_bounds = array<i64: 8, 128>}]} {
    %c0 = arith.constant 0 : index
    %c0_0 = arith.constant 0 : index
    %0 = vector.load %arg1[%c0, %c0_0] : memref<8x128xbf16, #tpu.memory_space<vmem>>, vector<8x128xbf16>
    %c0_1 = arith.constant 0 : index
    %c0_2 = arith.constant 0 : index
    %1 = vector.load %arg2[%c0_1, %c0_2] : memref<128x128xbf16, #tpu.memory_space<vmem>>, vector<128x128xbf16>
    %cst = arith.constant dense<0.000000e+00> : vector<8x128xf32>
    %2 = tpu.matmul %0, %1, %cst {dimension_numbers = #tpu.dot_dimension_numbers<[1], [0], [0], [1], [0, 0, 1, 1], [], []>} : vector<8x128xbf16>, vector<128x128xbf16>, vector<8x128xf32> -> vector<8x128xf32>
    %c0_3 = arith.constant 0 : index
    %c0_4 = arith.constant 0 : index
    %3 = vector.load %arg3[%c0_3, %c0_4] : memref<1x128xf32, #tpu.memory_space<vmem>>, vector<1x128xf32>
    %4 = vector.broadcast %3 : vector<1x128xf32> to vector<8x128xf32>
    %5 = arith.addf %2, %4 : vector<8x128xf32>
    %cst_5 = arith.constant 0.000000e+00 : f32
    %6 = vector.broadcast %cst_5 : f32 to vector<8x128xf32>
    %7 = arith.maximumf %5, %6 : vector<8x128xf32>
    %8 = arith.truncf %7 : vector<8x128xf32> to vector<8x128xbf16>
    %c0_6 = arith.constant 0 : index
    %c0_7 = arith.constant 0 : index
    %9 = vector.load %arg4[%c0_6, %c0_7] : memref<128x128xbf16, #tpu.memory_space<vmem>>, vector<128x128xbf16>
    %cst_8 = arith.constant dense<0.000000e+00> : vector<8x128xf32>
    %10 = tpu.matmul %8, %9, %cst_8 {dimension_numbers = #tpu.dot_dimension_numbers<[1], [0], [0], [1], [0, 0, 1, 1], [], []>} : vector<8x128xbf16>, vector<128x128xbf16>, vector<8x128xf32> -> vector<8x128xf32>
    %c0_9 = arith.constant 0 : index
    %c0_10 = arith.constant 0 : index
    %11 = vector.load %arg5[%c0_9, %c0_10] : memref<1x128xf32, #tpu.memory_space<vmem>>, vector<1x128xf32>
    %12 = vector.broadcast %11 : vector<1x128xf32> to vector<8x128xf32>
    %13 = arith.addf %10, %12 : vector<8x128xf32>
    %cst_11 = arith.constant 0.000000e+00 : f32
    %14 = vector.broadcast %cst_11 : f32 to vector<8x128xf32>
    %15 = arith.maximumf %13, %14 : vector<8x128xf32>
    %16 = arith.truncf %15 : vector<8x128xf32> to vector<8x128xbf16>
    %c0_12 = arith.constant 0 : index
    %c0_13 = arith.constant 0 : index
    %17 = vector.load %arg6[%c0_12, %c0_13] : memref<128x128xbf16, #tpu.memory_space<vmem>>, vector<128x128xbf16>
    %cst_14 = arith.constant dense<0.000000e+00> : vector<8x128xf32>
    %18 = tpu.matmul %16, %17, %cst_14 {dimension_numbers = #tpu.dot_dimension_numbers<[1], [0], [0], [1], [0, 0, 1, 1], [], []>} : vector<8x128xbf16>, vector<128x128xbf16>, vector<8x128xf32> -> vector<8x128xf32>
    %c0_15 = arith.constant 0 : index
    %c0_16 = arith.constant 0 : index
    %19 = vector.load %arg7[%c0_15, %c0_16] : memref<1x128xf32, #tpu.memory_space<vmem>>, vector<1x128xf32>
    %20 = vector.broadcast %19 : vector<1x128xf32> to vector<8x128xf32>
    %21 = arith.addf %18, %20 : vector<8x128xf32>
    %cst_17 = arith.constant 0.000000e+00 : f32
    %22 = vector.broadcast %cst_17 : f32 to vector<8x128xf32>
    %23 = arith.maximumf %21, %22 : vector<8x128xf32>
    %c0_18 = arith.constant 0 : index
    %c0_19 = arith.constant 0 : index
    %24 = vector.load %arg8[%c0_18, %c0_19] : memref<8x128xf32, #tpu.memory_space<vmem>>, vector<8x128xf32>
    tpu.vector_store %arg8[%c0_18, %c0_19], %23 {strides = array<i32>} : memref<8x128xf32, #tpu.memory_space<vmem>>, vector<8x128xf32>,
    return
  }
  func.func @transform_0(%arg0: i32) -> (i32, i32) {
    %c0_i32 = arith.constant 0 : i32
    %c0_i32_0 = arith.constant 0 : i32
    return %arg0, %c0_i32 : i32, i32
  }
  func.func @transform_1(%arg0: i32) -> (i32, i32) {
    %c0_i32 = arith.constant 0 : i32
    %c0_i32_0 = arith.constant 0 : i32
    %c0_i32_1 = arith.constant 0 : i32
    return %c0_i32, %c0_i32_0 : i32, i32
  }
  func.func @transform_2(%arg0: i32) -> (i32, i32) {
    %c0_i32 = arith.constant 0 : i32
    %c0_i32_0 = arith.constant 0 : i32
    %c0_i32_1 = arith.constant 0 : i32
    return %c0_i32, %c0_i32_0 : i32, i32
  }
  func.func @transform_3(%arg0: i32) -> (i32, i32) {
    %c0_i32 = arith.constant 0 : i32
    %c0_i32_0 = arith.constant 0 : i32
    %c0_i32_1 = arith.constant 0 : i32
    return %c0_i32, %c0_i32_0 : i32, i32
  }
  func.func @transform_4(%arg0: i32) -> (i32, i32) {
    %c0_i32 = arith.constant 0 : i32
    %c0_i32_0 = arith.constant 0 : i32
    %c0_i32_1 = arith.constant 0 : i32
    return %c0_i32, %c0_i32_0 : i32, i32
  }
  func.func @transform_5(%arg0: i32) -> (i32, i32) {
    %c0_i32 = arith.constant 0 : i32
    %c0_i32_0 = arith.constant 0 : i32
    %c0_i32_1 = arith.constant 0 : i32
    return %c0_i32, %c0_i32_0 : i32, i32
  }
  func.func @transform_6(%arg0: i32) -> (i32, i32) {
    %c0_i32 = arith.constant 0 : i32
    %c0_i32_0 = arith.constant 0 : i32
    %c0_i32_1 = arith.constant 0 : i32
    return %c0_i32, %c0_i32_0 : i32, i32
  }
  func.func @transform_7(%arg0: i32) -> (i32, i32) {
    %c0_i32 = arith.constant 0 : i32
    %c0_i32_0 = arith.constant 0 : i32
    return %arg0, %c0_i32 : i32, i32
  }
}

</mosaic_0001>

<bundles_post_ra>
// kernel: _fc_forward_impl.1
= control target key start
LH: loop header
LB: loop body
LE: loop exit
PB: predicated region body
PF: predicated region fallthrough
CT: control target
= control target key end

     0   :  { %12 = vsyncpa [#allocation3], 0  ;;  %s602_s0 = inlined_call_operand.vmem [shape: bf16[8,128], index: 0, kind: input, shape index: {}]   ;;  %s603_s1 = inlined_call_operand.hbm [shape: bf16[128,128], index: 1, kind: input, shape index: {}]   ;;  %s604_s2 = inlined_call_operand.vmem [shape: f32[1,128], index: 2, kind: input, shape index: {}]   ;;  %s605_s3 = inlined_call_operand.hbm [shape: bf16[128,128], index: 3, kind: input, shape index: {}]   ;;  %s606_s4 = inlined_call_operand.vmem [shape: f32[1,128], index: 4, kind: input, shape index: {}]   ;;  %s607_s5 = inlined_call_operand.hbm [shape: bf16[128,128], index: 5, kind: input, shape index: {}]   ;;  %s608_s6 = inlined_call_operand.vmem [shape: f32[1,128], index: 6, kind: input, shape index: {}]   ;;  %s609_s7 = inlined_call_operand.vmem [shape: f32[8,128], index: 7, kind: output, shape index: {}]  }
   0x1   :  { %13 = vsyncpa [#allocation5], 0  ;;  %s35_s26 = sshll.u32 %s605_s3, 4  ;;  %s533_s27 = smov [#allocation4]   ;;  %s36_s26 = int_to_ptr.hbm [resolvable:$true] %s35_s26 }
   0x2   :  { %s37_s28 = sshll.u32 %s533_s27, 4  ;;  %s20_s8 = sshll.u32 %s603_s1, 4  ;;  %s38_s28 = int_to_ptr.vmem [resolvable:$true] %s37_s28  ;;  %s21_s8 = int_to_ptr.hbm [resolvable:$true] %s20_s8 }
   0x3   :  { %s534_s9 = smov 64   ;;  %s535_s10 = smov 4  }
   0x4   :  { %43 = dma.hbm_to_vmem [thread:$0]  %s36_s26, 1024, %s38_s28, [#allocation5], %s534_s9, %s534_s9, %s535_s10  }
   0x5   :  { %s536_s11 = smov [#allocation2]   ;;  %s50_s15 = sshll.u32 %s607_s5, 4  ;;  %s51_s15 = int_to_ptr.hbm [resolvable:$true] %s50_s15 }
   0x6   :  { %s22_s12 = sshll.u32 %s536_s11, 4  ;;  %s537_s3 = smov [#allocation6]   ;;  %s23_s12 = int_to_ptr.vmem [resolvable:$true] %s22_s12 }
   0x7   :  { %28 = dma.hbm_to_vmem [thread:$0]  %s21_s8, 1024, %s23_s12, [#allocation3], %s534_s9, %s534_s9, %s535_s10  }
   0x8   :  { %s52_s16 = sshll.u32 %s537_s3, 4  ;;  %s53_s16 = int_to_ptr.vmem [resolvable:$true] %s52_s16 }
   0x9   :  { %58 = dma.hbm_to_vmem [thread:$0]  %s51_s15, 1024, %s53_s16, [#allocation5], %s534_s9, %s534_s9, %s535_s10  }
   0xa   :  { %529 = dma.done.wait [#allocation3], 1024  }
   0xb   :  { %530 = vsyncadd [#allocation3], 4294966272 }
   0xc   :  { %531 = dma.done.wait [#allocation5], 2048  }
   0xd   :  { %532 = vsyncadd [#allocation5], 4294965248  ;;  %v432_v0 = vld [vmem:[#allocation2 + $0x38] sm:$0xff]  ;;  %v431_v1 = vld [vmem:[#allocation2 + $0x30] sm:$0xff] }
   0xe   :  { %142 = vmatpush.bf16.msra.mxu0 %v432_v0  ;;  %v440_v2 = vld [vmem:[#allocation4 + $0x38] sm:$0xff]  ;;  %v439_v3 = vld [vmem:[#allocation4 + $0x30] sm:$0xff]  ;;  %v430_v4 = vld [vmem:[#allocation2 + $0x28] sm:$0xff] }
   0xf   :  { %225 = vmatpush.bf16.msra.mxu1 %v440_v2  ;;  %v438_v5 = vld [vmem:[#allocation4 + $0x28] sm:$0xff]  ;;  %v429_v6 = vld [vmem:[#allocation2 + $0x20] sm:$0xff]  ;;  %v428_v8 = vld [vmem:[#allocation2 + $0x18] sm:$0xff] }
  0x10   :  { %v437_v7 = vld [vmem:[#allocation4 + $0x20] sm:$0xff]  ;;  %v436_v9 = vld [vmem:[#allocation4 + $0x18] sm:$0xff]  ;;  %v427_v10 = vld [vmem:[#allocation2 + $0x10] sm:$0xff] }
  0x11   :  { %v435_v11 = vld [vmem:[#allocation4 + $0x10] sm:$0xff]  ;;  %v426_v12 = vld [vmem:[#allocation2 + $0x8] sm:$0xff]  ;;  %v425_v13 = vld [vmem:[#allocation2] sm:$0xff] }
  0x12   :  { %143 = vmatpush.bf16.msra.mxu0 %v431_v1  ;;  %v73_v14 = vld [vmem:[%s602_s0] sm:$0xf]  ;;  %v434_v15 = vld [vmem:[#allocation4 + $0x8] sm:$0xff]  ;;  %v448_v17 = vld [vmem:[#allocation6 + $0x38] sm:$0xff] }
  0x13   :  { %226 = vmatpush.bf16.msra.mxu1 %v439_v3  ;;  %v433_v16 = vld [vmem:[#allocation4] sm:$0xff]  ;;  %308 = vmatpush.bf16.msra.mxu2 %v448_v17  ;;  %v447_v18 = vld [vmem:[#allocation6 + $0x30] sm:$0xff]  ;;  %v446_v19 = vld [vmem:[#allocation6 + $0x28] sm:$0xff] }
  0x14   :  { %v445_v20 = vld [vmem:[#allocation6 + $0x20] sm:$0xff]  ;;  %v444_v21 = vld [vmem:[#allocation6 + $0x18] sm:$0xff]  ;;  %v443_v22 = vld [vmem:[#allocation6 + $0x10] sm:$0xff] }
  0x15   :  { %v454_v23 = vld [vmem:[%s604_s2] ss:$0 sm:$0xff]  ;;  %v442_v29 = vld [vmem:[#allocation6 + $0x8] sm:$0xff] }
  0x16   :  { %144 = vmatpush.bf16.msra.mxu0 %v430_v4  ;;  %v441_v30 = vld [vmem:[#allocation6] sm:$0xff] }
  0x17   :  { %227 = vmatpush.bf16.msra.mxu1 %v438_v5  ;;  %309 = vmatpush.bf16.msra.mxu2 %v447_v18  ;;  %v455_v31 = vld [vmem:[%s606_s4] ss:$0 sm:$0xff] }
  0x18   :  { %v456_v37 = vld [vmem:[%s608_s6] ss:$0 sm:$0xff] }
  0x1a   :  { %145 = vmatpush.bf16.msra.mxu0 %v429_v6 }
  0x1b   :  { %228 = vmatpush.bf16.msra.mxu1 %v437_v7  ;;  %310 = vmatpush.bf16.msra.mxu2 %v446_v19 }
  0x1e   :  { %146 = vmatpush.bf16.msra.mxu0 %v428_v8 }
  0x1f   :  { %229 = vmatpush.bf16.msra.mxu1 %v436_v9  ;;  %311 = vmatpush.bf16.msra.mxu2 %v445_v20 }
  0x22   :  { %147 = vmatpush.bf16.msra.mxu0 %v427_v10 }
  0x23   :  { %230 = vmatpush.bf16.msra.mxu1 %v435_v11  ;;  %312 = vmatpush.bf16.msra.mxu2 %v444_v21 }
  0x26   :  { %148 = vmatpush.bf16.msra.mxu0 %v426_v12 }
  0x27   :  { %231 = vmatpush.bf16.msra.mxu1 %v434_v15  ;;  %313 = vmatpush.bf16.msra.mxu2 %v443_v22 }
  0x2a   :  { %149 = vmatpush.bf16.msra.mxu0 %v425_v13 }
  0x2b   :  { %232 = vmatpush.bf16.msra.mxu1 %v433_v16  ;;  %314 = vmatpush.bf16.msra.mxu2 %v442_v29 }
  0x2d   :  { %150 = vmatmul.bf16.vlgmr.msra.gmra.mxu0 %v73_v14 }
  0x2f   :  { %315 = vmatpush.bf16.msra.mxu2 %v441_v30 }
  0xaa   :  { %v151_v24 = vpop.f32.mrf.mxu0 }
  0xab   :  { %v152_v25 = vadd.f32 %v454_v23, %v151_v24 }
  0xad   :  { %v155_v26 = vmax.f32 %v152_v25, 0.0 }
  0xaf   :  { %v156_v27 = vpack.c.bf16 %v155_v26, %v155_v26 }
  0xb1   :  { %233 = vmatmul.bf16.vlgmr.msra.gmra.mxu1 %v156_v27 }
  0xb2   :  { %v153_v28 = vpop.f32.mrf.mxu0 }
 0x12e   :  { %v234_v32 = vpop.f32.mrf.mxu1 }
 0x12f   :  { %v235_v33 = vadd.f32 %v455_v31, %v234_v32 }
 0x131   :  { %v238_v34 = vmax.f32 %v235_v33, 0.0 }
 0x133   :  { %v239_v35 = vpack.c.bf16 %v238_v34, %v238_v34 }
 0x135   :  { %316 = vmatmul.bf16.vlgmr.msra.gmra.mxu2 %v239_v35 }
 0x136   :  { %v236_v36 = vpop.f32.mrf.mxu1 }
 0x1b8   :  { %v317_v38 = vpop.f32.mrf.mxu2 }
 0x1b9   :  { %v318_v39 = vadd.f32 %v456_v37, %v317_v38 }
 0x1bb   :  { %v321_v40 = vmax.f32 %v318_v39, 0.0 }
 0x1bd   :  { %322 = vst [vmem:[%s609_s7] sm:$0xff] %v321_v40 }
 0x1c0   :  { %v319_v41 = vpop.f32.mrf.mxu2 }
 0x1c1   :  { %327 = vsyncpa [#allocation3], 1 }
 0x1c2   :  { %328 = vsyncpa [#allocation5], 1 }

// kernel: _fc_forward_impl.1
= control target key start
LH: loop header
LB: loop body
LE: loop exit
PB: predicated region body
PF: predicated region fallthrough
CT: control target
= control target key end

     0   :  { %12 = vsyncpa [#allocation3], 0  ;;  %s602_s0 = inlined_call_operand.vmem [shape: bf16[8,128], index: 0, kind: input, shape index: {}]   ;;  %s603_s1 = inlined_call_operand.hbm [shape: bf16[128,128], index: 1, kind: input, shape index: {}]   ;;  %s604_s2 = inlined_call_operand.vmem [shape: f32[1,128], index: 2, kind: input, shape index: {}]   ;;  %s605_s3 = inlined_call_operand.hbm [shape: bf16[128,128], index: 3, kind: input, shape index: {}]   ;;  %s606_s4 = inlined_call_operand.vmem [shape: f32[1,128], index: 4, kind: input, shape index: {}]   ;;  %s607_s5 = inlined_call_operand.hbm [shape: bf16[128,128], index: 5, kind: input, shape index: {}]   ;;  %s608_s6 = inlined_call_operand.vmem [shape: f32[1,128], index: 6, kind: input, shape index: {}]   ;;  %s609_s7 = inlined_call_operand.vmem [shape: f32[8,128], index: 7, kind: output, shape index: {}]  }
   0x1   :  { %13 = vsyncpa [#allocation5], 0  ;;  %s35_s26 = sshll.u32 %s605_s3, 4  ;;  %s533_s27 = smov [#allocation4]   ;;  %s36_s26 = int_to_ptr.hbm [resolvable:$true] %s35_s26 }
   0x2   :  { %s37_s28 = sshll.u32 %s533_s27, 4  ;;  %s20_s8 = sshll.u32 %s603_s1, 4  ;;  %s38_s28 = int_to_ptr.vmem [resolvable:$true] %s37_s28  ;;  %s21_s8 = int_to_ptr.hbm [resolvable:$true] %s20_s8 }
   0x3   :  { %s534_s9 = smov 64   ;;  %s535_s10 = smov 4  }
   0x4   :  { %43 = dma.hbm_to_vmem [thread:$0]  %s36_s26, 1024, %s38_s28, [#allocation5], %s534_s9, %s534_s9, %s535_s10  }
   0x5   :  { %s536_s11 = smov [#allocation2]   ;;  %s50_s15 = sshll.u32 %s607_s5, 4  ;;  %s51_s15 = int_to_ptr.hbm [resolvable:$true] %s50_s15 }
   0x6   :  { %s22_s12 = sshll.u32 %s536_s11, 4  ;;  %s537_s3 = smov [#allocation6]   ;;  %s23_s12 = int_to_ptr.vmem [resolvable:$true] %s22_s12 }
   0x7   :  { %28 = dma.hbm_to_vmem [thread:$0]  %s21_s8, 1024, %s23_s12, [#allocation3], %s534_s9, %s534_s9, %s535_s10  }
   0x8   :  { %s52_s16 = sshll.u32 %s537_s3, 4  ;;  %s53_s16 = int_to_ptr.vmem [resolvable:$true] %s52_s16 }
   0x9   :  { %58 = dma.hbm_to_vmem [thread:$0]  %s51_s15, 1024, %s53_s16, [#allocation5], %s534_s9, %s534_s9, %s535_s10  }
   0xa   :  { %529 = dma.done.wait [#allocation3], 1024  }
   0xb   :  { %530 = vsyncadd [#allocation3], 4294966272 }
   0xc   :  { %531 = dma.done.wait [#allocation5], 2048  }
   0xd   :  { %532 = vsyncadd [#allocation5], 4294965248  ;;  %v432_v0 = vld [vmem:[#allocation2 + $0x38] sm:$0xff]  ;;  %v431_v1 = vld [vmem:[#allocation2 + $0x30] sm:$0xff] }
   0xe   :  { %142 = vmatpush.bf16.msra.mxu0 %v432_v0  ;;  %v440_v2 = vld [vmem:[#allocation4 + $0x38] sm:$0xff]  ;;  %v439_v3 = vld [vmem:[#allocation4 + $0x30] sm:$0xff]  ;;  %v430_v4 = vld [vmem:[#allocation2 + $0x28] sm:$0xff] }
   0xf   :  { %225 = vmatpush.bf16.msra.mxu1 %v440_v2  ;;  %v438_v5 = vld [vmem:[#allocation4 + $0x28] sm:$0xff]  ;;  %v429_v6 = vld [vmem:[#allocation2 + $0x20] sm:$0xff]  ;;  %v428_v8 = vld [vmem:[#allocation2 + $0x18] sm:$0xff] }
  0x10   :  { %v437_v7 = vld [vmem:[#allocation4 + $0x20] sm:$0xff]  ;;  %v436_v9 = vld [vmem:[#allocation4 + $0x18] sm:$0xff]  ;;  %v427_v10 = vld [vmem:[#allocation2 + $0x10] sm:$0xff] }
  0x11   :  { %v435_v11 = vld [vmem:[#allocation4 + $0x10] sm:$0xff]  ;;  %v426_v12 = vld [vmem:[#allocation2 + $0x8] sm:$0xff]  ;;  %v425_v13 = vld [vmem:[#allocation2] sm:$0xff] }
  0x12   :  { %143 = vmatpush.bf16.msra.mxu0 %v431_v1  ;;  %v73_v14 = vld [vmem:[%s602_s0] sm:$0xf]  ;;  %v434_v15 = vld [vmem:[#allocation4 + $0x8] sm:$0xff]  ;;  %v448_v17 = vld [vmem:[#allocation6 + $0x38] sm:$0xff] }
  0x13   :  { %226 = vmatpush.bf16.msra.mxu1 %v439_v3  ;;  %v433_v16 = vld [vmem:[#allocation4] sm:$0xff]  ;;  %308 = vmatpush.bf16.msra.mxu2 %v448_v17  ;;  %v447_v18 = vld [vmem:[#allocation6 + $0x30] sm:$0xff]  ;;  %v446_v19 = vld [vmem:[#allocation6 + $0x28] sm:$0xff] }
  0x14   :  { %v445_v20 = vld [vmem:[#allocation6 + $0x20] sm:$0xff]  ;;  %v444_v21 = vld [vmem:[#allocation6 + $0x18] sm:$0xff]  ;;  %v443_v22 = vld [vmem:[#allocation6 + $0x10] sm:$0xff] }
  0x15   :  { %v454_v23 = vld [vmem:[%s604_s2] ss:$0 sm:$0xff]  ;;  %v442_v29 = vld [vmem:[#allocation6 + $0x8] sm:$0xff] }
  0x16   :  { %144 = vmatpush.bf16.msra.mxu0 %v430_v4  ;;  %v441_v30 = vld [vmem:[#allocation6] sm:$0xff] }
  0x17   :  { %227 = vmatpush.bf16.msra.mxu1 %v438_v5  ;;  %309 = vmatpush.bf16.msra.mxu2 %v447_v18  ;;  %v455_v31 = vld [vmem:[%s606_s4] ss:$0 sm:$0xff] }
  0x18   :  { %v456_v37 = vld [vmem:[%s608_s6] ss:$0 sm:$0xff] }
  0x1a   :  { %145 = vmatpush.bf16.msra.mxu0 %v429_v6 }
  0x1b   :  { %228 = vmatpush.bf16.msra.mxu1 %v437_v7  ;;  %310 = vmatpush.bf16.msra.mxu2 %v446_v19 }
  0x1e   :  { %146 = vmatpush.bf16.msra.mxu0 %v428_v8 }
  0x1f   :  { %229 = vmatpush.bf16.msra.mxu1 %v436_v9  ;;  %311 = vmatpush.bf16.msra.mxu2 %v445_v20 }
  0x22   :  { %147 = vmatpush.bf16.msra.mxu0 %v427_v10 }
  0x23   :  { %230 = vmatpush.bf16.msra.mxu1 %v435_v11  ;;  %312 = vmatpush.bf16.msra.mxu2 %v444_v21 }
  0x26   :  { %148 = vmatpush.bf16.msra.mxu0 %v426_v12 }
  0x27   :  { %231 = vmatpush.bf16.msra.mxu1 %v434_v15  ;;  %313 = vmatpush.bf16.msra.mxu2 %v443_v22 }
  0x2a   :  { %149 = vmatpush.bf16.msra.mxu0 %v425_v13 }
  0x2b   :  { %232 = vmatpush.bf16.msra.mxu1 %v433_v16  ;;  %314 = vmatpush.bf16.msra.mxu2 %v442_v29 }
  0x2d   :  { %150 = vmatmul.bf16.vlgmr.msra.gmra.mxu0 %v73_v14 }
  0x2f   :  { %315 = vmatpush.bf16.msra.mxu2 %v441_v30 }
  0xaa   :  { %v151_v24 = vpop.f32.mrf.mxu0 }
  0xab   :  { %v152_v25 = vadd.f32 %v454_v23, %v151_v24 }
  0xad   :  { %v155_v26 = vmax.f32 %v152_v25, 0.0 }
  0xaf   :  { %v156_v27 = vpack.c.bf16 %v155_v26, %v155_v26 }
  0xb1   :  { %233 = vmatmul.bf16.vlgmr.msra.gmra.mxu1 %v156_v27 }
  0xb2   :  { %v153_v28 = vpop.f32.mrf.mxu0 }
 0x12e   :  { %v234_v32 = vpop.f32.mrf.mxu1 }
 0x12f   :  { %v235_v33 = vadd.f32 %v455_v31, %v234_v32 }
 0x131   :  { %v238_v34 = vmax.f32 %v235_v33, 0.0 }
 0x133   :  { %v239_v35 = vpack.c.bf16 %v238_v34, %v238_v34 }
 0x135   :  { %316 = vmatmul.bf16.vlgmr.msra.gmra.mxu2 %v239_v35 }
 0x136   :  { %v236_v36 = vpop.f32.mrf.mxu1 }
 0x1b8   :  { %v317_v38 = vpop.f32.mrf.mxu2 }
 0x1b9   :  { %v318_v39 = vadd.f32 %v456_v37, %v317_v38 }
 0x1bb   :  { %v321_v40 = vmax.f32 %v318_v39, 0.0 }
 0x1bd   :  { %322 = vst [vmem:[%s609_s7] sm:$0xff] %v321_v40 }
 0x1c0   :  { %v319_v41 = vpop.f32.mrf.mxu2 }
 0x1c1   :  { %327 = vsyncpa [#allocation3], 1 }
 0x1c2   :  { %328 = vsyncpa [#allocation5], 1 }

</bundles_post_ra>
